<compile_context>
chip_gen: v7x
topology: tpu7x:2x2x1
jax: 0.10.0
libtpu: 0.0.40
codegen_flags: <defaults>
</compile_context>

<pallas_src>
import jax
import jax.numpy as jnp
from jax.experimental import pallas as pl
from jax.experimental.pallas import tpu as pltpu

_LANE = 128
_MASK_LOGIT = -1e30  # bias for padded logit columns -> exp underflows to exactly 0


def _round_up(x, m):
    return (x + m - 1) // m * m


def actor_kernel(x_ref, w1_ref, b1_ref, w2_ref, b2_ref, w3_ref, b3_ref, out_ref):
    # One batch tile per grid step; weights are whole-array resident blocks.
    x = x_ref[...]
    h1 = jnp.maximum(
        jnp.dot(x, w1_ref[...], preferred_element_type=jnp.float32) + b1_ref[...], 0.0)
    h2 = jnp.maximum(
        jnp.dot(h1, w2_ref[...], preferred_element_type=jnp.float32) + b2_ref[...], 0.0)
    logits = jnp.dot(h2, w3_ref[...], preferred_element_type=jnp.float32) + b3_ref[...]
    # Numerically-stable softmax over the lane-dense last dim; padded columns hold
    # -1e30 logits and contribute exactly zero mass.
    m = jnp.max(logits, axis=-1, keepdims=True)
    e = jnp.exp(logits - m)
    inv = pl.reciprocal(jnp.sum(e, axis=-1, keepdims=True), approx=False)
    out_ref[...] = e * inv


@jax.jit
def actor_forward(x, w1, b1, w2, b2, w3, b3):
    """x: (B, state_dim); wN: (in, out); bN: (1, out).  Returns (B, num_items) probs."""
    B, state_dim = x.shape
    hidden = w1.shape[1]
    num_items = w3.shape[1]

    kp = _round_up(state_dim, _LANE)     # padded contraction dim of fc1
    hp = _round_up(hidden, _LANE)        # padded hidden dim
    np_ = _round_up(num_items, _LANE)    # padded (lane-dense) output dim
    tb = min(256, _round_up(B, 8))       # batch rows per grid step (sublane-aligned)
    bp = _round_up(B, tb)

    f32 = jnp.float32
    xp = jnp.pad(x.astype(f32), ((0, bp - B), (0, kp - state_dim)))
    w1p = jnp.pad(w1.astype(f32), ((0, kp - state_dim), (0, hp - hidden)))
    b1p = jnp.pad(b1.astype(f32), ((0, 0), (0, hp - hidden)))
    w2p = jnp.pad(w2.astype(f32), ((0, hp - hidden), (0, hp - hidden)))
    b2p = jnp.pad(b2.astype(f32), ((0, 0), (0, hp - hidden)))
    w3p = jnp.pad(w3.astype(f32), ((0, hp - hidden), (0, np_ - num_items)))
    # Padded logit columns must not absorb probability mass -> mask via the bias.
    b3p = jnp.pad(b3.astype(f32), ((0, 0), (0, np_ - num_items)),
                  constant_values=_MASK_LOGIT)

    probs_padded = pl.pallas_call(
        actor_kernel,
        out_shape=jax.ShapeDtypeStruct((bp, np_), jnp.float32),
        grid=(bp // tb,),
        in_specs=[
            pl.BlockSpec((tb, kp), lambda i: (i, 0)),     # x: tiled over batch
            pl.BlockSpec((kp, hp), lambda i: (0, 0)),     # weights/biases: resident
            pl.BlockSpec((1, hp), lambda i: (0, 0)),
            pl.BlockSpec((hp, hp), lambda i: (0, 0)),
            pl.BlockSpec((1, hp), lambda i: (0, 0)),
            pl.BlockSpec((hp, np_), lambda i: (0, 0)),
            pl.BlockSpec((1, np_), lambda i: (0, 0)),
        ],
        out_specs=pl.BlockSpec((tb, np_), lambda i: (i, 0)),
        compiler_params=pltpu.CompilerParams(
            dimension_semantics=("parallel",)),
    )(xp, w1p, b1p, w2p, b2p, w3p, b3p)
    return probs_padded[:B, :num_items]


def orthogonal(key, shape, gain):
    # Deterministic orthogonal init (torch.nn.init.orthogonal_ semantics):
    # QR of a gaussian, sign-corrected, scaled by gain.  shape = (out, in).
    rows, cols = shape
    flat = jax.random.normal(key, (max(rows, cols), min(rows, cols)), dtype=jnp.float32)
    q, r = jnp.linalg.qr(flat)
    q = q * jnp.sign(jnp.diag(r))
    if rows < cols:
        q = q.T
    return gain * q[:rows, :cols]


def make_params(key, state_dim, hidden_size, num_items):
    gain = jnp.sqrt(2.0)
    k1, k2, k3 = jax.random.split(key, 3)
    # PyTorch Linear weight is (out, in); transpose to (in, out) for the kernel layout.
    w1 = orthogonal(k1, (hidden_size, state_dim), gain).T
    w2 = orthogonal(k2, (hidden_size, hidden_size), gain).T
    w3 = orthogonal(k3, (num_items, hidden_size), gain).T
    b1 = jnp.zeros((1, hidden_size), jnp.float32)
    b2 = jnp.zeros((1, hidden_size), jnp.float32)
    b3 = jnp.zeros((1, num_items), jnp.float32)
    return w1, b1, w2, b2, w3, b3


if __name__ == "__main__":
    batch = 8
    state_dim = 16
    hidden_size = 32
    num_items = 16

    key = jax.random.PRNGKey(0)
    kx, kp = jax.random.split(key)
    x = jax.random.normal(kx, (batch, state_dim), dtype=jnp.float32)
    params = make_params(kp, state_dim, hidden_size, num_items)

    probs = actor_forward(x, *params)
    jax.block_until_ready(probs)

    # sanity: shape and rows of a softmax sum to 1
    assert probs.shape == (batch, num_items)
    assert bool(jnp.allclose(jnp.sum(probs, axis=-1), 1.0, atol=1e-5))

    # reference check against plain JAX (unpadded math)
    w1, b1, w2, b2, w3, b3 = params
    h1 = jnp.maximum(x @ w1 + b1, 0.0)
    h2 = jnp.maximum(h1 @ w2 + b2, 0.0)
    ref = jax.nn.softmax(h2 @ w3 + b3, axis=-1)
    assert bool(jnp.allclose(probs, ref, atol=1e-5))

    # TODO(synk): get_action's multinomial sampling / gather stays in plain JAX
    # (jax.random.categorical / take_along_axis) outside the kernel.
    print("KERNEL_OK")
</pallas_src>

<mosaic_0001>
module attributes {stable_mosaic.version = 11 : i64} {
  func.func @actor_kernel(%arg0: i32, %arg1: memref<8x128xf32, #tpu.memory_space<vmem>>, %arg2: memref<128x128xf32, #tpu.memory_space<vmem>>, %arg3: memref<1x128xf32, #tpu.memory_space<vmem>>, %arg4: memref<128x128xf32, #tpu.memory_space<vmem>>, %arg5: memref<1x128xf32, #tpu.memory_space<vmem>>, %arg6: memref<128x128xf32, #tpu.memory_space<vmem>>, %arg7: memref<1x128xf32, #tpu.memory_space<vmem>>, %arg8: memref<8x128xf32, #tpu.memory_space<vmem>>) attributes {dimension_semantics = [#tpu.dimension_semantics<parallel>], iteration_bounds = array<i64: 1>, scalar_prefetch = 0 : i64, scratch_operands = 0 : i64, tpu.core_type = #tpu.core_type<tc>, window_params = [{transform_indices = @transform_0, window_bounds = array<i64: 8, 128>}, {pipeline_mode = #tpu.pipeline_mode<synchronous>, transform_indices = @transform_1, window_bounds = array<i64: 128, 128>}, {pipeline_mode = #tpu.pipeline_mode<synchronous>, transform_indices = @transform_2, window_bounds = array<i64: 1, 128>}, {pipeline_mode = #tpu.pipeline_mode<synchronous>, transform_indices = @transform_3, window_bounds = array<i64: 128, 128>}, {pipeline_mode = #tpu.pipeline_mode<synchronous>, transform_indices = @transform_4, window_bounds = array<i64: 1, 128>}, {pipeline_mode = #tpu.pipeline_mode<synchronous>, transform_indices = @transform_5, window_bounds = array<i64: 128, 128>}, {pipeline_mode = #tpu.pipeline_mode<synchronous>, transform_indices = @transform_6, window_bounds = array<i64: 1, 128>}, {transform_indices = @transform_7, window_bounds = array<i64: 8, 128>}]} {
    %c0 = arith.constant 0 : index
    %c0_0 = arith.constant 0 : index
    %0 = vector.load %arg1[%c0, %c0_0] : memref<8x128xf32, #tpu.memory_space<vmem>>, vector<8x128xf32>
    %c0_1 = arith.constant 0 : index
    %c0_2 = arith.constant 0 : index
    %1 = vector.load %arg2[%c0_1, %c0_2] : memref<128x128xf32, #tpu.memory_space<vmem>>, vector<128x128xf32>
    %cst = arith.constant dense<0.000000e+00> : vector<8x128xf32>
    %2 = tpu.matmul %0, %1, %cst {dimension_numbers = #tpu.dot_dimension_numbers<[1], [0], [0], [1], [0, 0, 1, 1], [], []>} : vector<8x128xf32>, vector<128x128xf32>, vector<8x128xf32> -> vector<8x128xf32>
    %c0_3 = arith.constant 0 : index
    %c0_4 = arith.constant 0 : index
    %3 = vector.load %arg3[%c0_3, %c0_4] : memref<1x128xf32, #tpu.memory_space<vmem>>, vector<1x128xf32>
    %4 = vector.broadcast %3 : vector<1x128xf32> to vector<8x128xf32>
    %5 = arith.addf %2, %4 : vector<8x128xf32>
    %cst_5 = arith.constant 0.000000e+00 : f32
    %6 = vector.broadcast %cst_5 : f32 to vector<8x128xf32>
    %7 = arith.maximumf %5, %6 : vector<8x128xf32>
    %c0_6 = arith.constant 0 : index
    %c0_7 = arith.constant 0 : index
    %8 = vector.load %arg4[%c0_6, %c0_7] : memref<128x128xf32, #tpu.memory_space<vmem>>, vector<128x128xf32>
    %cst_8 = arith.constant dense<0.000000e+00> : vector<8x128xf32>
    %9 = tpu.matmul %7, %8, %cst_8 {dimension_numbers = #tpu.dot_dimension_numbers<[1], [0], [0], [1], [0, 0, 1, 1], [], []>} : vector<8x128xf32>, vector<128x128xf32>, vector<8x128xf32> -> vector<8x128xf32>
    %c0_9 = arith.constant 0 : index
    %c0_10 = arith.constant 0 : index
    %10 = vector.load %arg5[%c0_9, %c0_10] : memref<1x128xf32, #tpu.memory_space<vmem>>, vector<1x128xf32>
    %11 = vector.broadcast %10 : vector<1x128xf32> to vector<8x128xf32>
    %12 = arith.addf %9, %11 : vector<8x128xf32>
    %cst_11 = arith.constant 0.000000e+00 : f32
    %13 = vector.broadcast %cst_11 : f32 to vector<8x128xf32>
    %14 = arith.maximumf %12, %13 : vector<8x128xf32>
    %c0_12 = arith.constant 0 : index
    %c0_13 = arith.constant 0 : index
    %15 = vector.load %arg6[%c0_12, %c0_13] : memref<128x128xf32, #tpu.memory_space<vmem>>, vector<128x128xf32>
    %cst_14 = arith.constant dense<0.000000e+00> : vector<8x128xf32>
    %16 = tpu.matmul %14, %15, %cst_14 {dimension_numbers = #tpu.dot_dimension_numbers<[1], [0], [0], [1], [0, 0, 1, 1], [], []>} : vector<8x128xf32>, vector<128x128xf32>, vector<8x128xf32> -> vector<8x128xf32>
    %c0_15 = arith.constant 0 : index
    %c0_16 = arith.constant 0 : index
    %17 = vector.load %arg7[%c0_15, %c0_16] : memref<1x128xf32, #tpu.memory_space<vmem>>, vector<1x128xf32>
    %18 = vector.broadcast %17 : vector<1x128xf32> to vector<8x128xf32>
    %19 = arith.addf %16, %18 : vector<8x128xf32>
    %cst_17 = arith.constant dense<0xFF800000> : vector<8xf32>
    %20 = vector.multi_reduction <maximumf>, %19, %cst_17 [1] : vector<8x128xf32> to vector<8xf32>
    %21 = vector.shape_cast %20 : vector<8xf32> to vector<8x1xf32>
    %22 = vector.broadcast %21 : vector<8x1xf32> to vector<8x128xf32>
    %23 = arith.subf %19, %22 : vector<8x128xf32>
    %24 = math.exp %23 : vector<8x128xf32>
    %cst_18 = arith.constant dense<0.000000e+00> : vector<8xf32>
    %25 = vector.multi_reduction <add>, %24, %cst_18 [1] : vector<8x128xf32> to vector<8xf32>
    %26 = vector.shape_cast %25 : vector<8xf32> to vector<8x1xf32>
    %27 = tpu.reciprocal %26 : vector<8x1xf32> -> vector<8x1xf32>
    %28 = vector.broadcast %27 : vector<8x1xf32> to vector<8x128xf32>
    %29 = arith.mulf %24, %28 : vector<8x128xf32>
    %c0_19 = arith.constant 0 : index
    %c0_20 = arith.constant 0 : index
    %30 = vector.load %arg8[%c0_19, %c0_20] : memref<8x128xf32, #tpu.memory_space<vmem>>, vector<8x128xf32>
    tpu.vector_store %arg8[%c0_19, %c0_20], %29 {strides = array<i32>} : memref<8x128xf32, #tpu.memory_space<vmem>>, vector<8x128xf32>,
    return
  }
  func.func @transform_0(%arg0: i32) -> (i32, i32) {
    %c0_i32 = arith.constant 0 : i32
    %c0_i32_0 = arith.constant 0 : i32
    return %arg0, %c0_i32 : i32, i32
  }
  func.func @transform_1(%arg0: i32) -> (i32, i32) {
    %c0_i32 = arith.constant 0 : i32
    %c0_i32_0 = arith.constant 0 : i32
    %c0_i32_1 = arith.constant 0 : i32
    return %c0_i32, %c0_i32_0 : i32, i32
  }
  func.func @transform_2(%arg0: i32) -> (i32, i32) {
    %c0_i32 = arith.constant 0 : i32
    %c0_i32_0 = arith.constant 0 : i32
    %c0_i32_1 = arith.constant 0 : i32
    return %c0_i32, %c0_i32_0 : i32, i32
  }
  func.func @transform_3(%arg0: i32) -> (i32, i32) {
    %c0_i32 = arith.constant 0 : i32
    %c0_i32_0 = arith.constant 0 : i32
    %c0_i32_1 = arith.constant 0 : i32
    return %c0_i32, %c0_i32_0 : i32, i32
  }
  func.func @transform_4(%arg0: i32) -> (i32, i32) {
    %c0_i32 = arith.constant 0 : i32
    %c0_i32_0 = arith.constant 0 : i32
    %c0_i32_1 = arith.constant 0 : i32
    return %c0_i32, %c0_i32_0 : i32, i32
  }
  func.func @transform_5(%arg0: i32) -> (i32, i32) {
    %c0_i32 = arith.constant 0 : i32
    %c0_i32_0 = arith.constant 0 : i32
    %c0_i32_1 = arith.constant 0 : i32
    return %c0_i32, %c0_i32_0 : i32, i32
  }
  func.func @transform_6(%arg0: i32) -> (i32, i32) {
    %c0_i32 = arith.constant 0 : i32
    %c0_i32_0 = arith.constant 0 : i32
    %c0_i32_1 = arith.constant 0 : i32
    return %c0_i32, %c0_i32_0 : i32, i32
  }
  func.func @transform_7(%arg0: i32) -> (i32, i32) {
    %c0_i32 = arith.constant 0 : i32
    %c0_i32_0 = arith.constant 0 : i32
    return %arg0, %c0_i32 : i32, i32
  }
}

</mosaic_0001>

<bundles_post_ra>
// kernel: actor_forward.1
= control target key start
LH: loop header
LB: loop body
LE: loop exit
PB: predicated region body
PF: predicated region fallthrough
CT: control target
= control target key end

     0   :  { %v596_v3 = vmov 0.0|0.0   ;;  %vm597_vm0 = vmmov 0   ;;  %v598_v6 = vmov 0.0   ;;  %s838_s0 = inlined_call_operand.vmem [shape: f32[8,128], index: 0, kind: input, shape index: {}]   ;;  %s839_s1 = inlined_call_operand.vmem [shape: f32[128,128], index: 1, kind: input, shape index: {}]   ;;  %s840_s2 = inlined_call_operand.vmem [shape: f32[1,128], index: 2, kind: input, shape index: {}]   ;;  %s841_s3 = inlined_call_operand.vmem [shape: f32[128,128], index: 3, kind: input, shape index: {}]   ;;  %s842_s4 = inlined_call_operand.vmem [shape: f32[1,128], index: 4, kind: input, shape index: {}]   ;;  %s843_s5 = inlined_call_operand.vmem [shape: f32[128,128], index: 5, kind: input, shape index: {}]   ;;  %s844_s6 = inlined_call_operand.vmem [shape: f32[1,128], index: 6, kind: input, shape index: {}]   ;;  %s845_s7 = inlined_call_operand.hbm [shape: f32[8,128], index: 7, kind: output, shape index: {}]  }
   0x1   :  { %v28_v0 = vld [vmem:[%s839_s1] sm:$0xff]  ;;  %v29_v1 = vld [vmem:[%s839_s1 + $0x8] sm:$0xff]  ;;  %v30_v2 = vld [vmem:[%s839_s1 + $0x10] sm:$0xff]  ;;  %492 = vmatprep.subr.bf16.mxu0 %v596_v3  ;;  %419 = vmatprep.mubr.msk.f32.mxu0 %vm597_vm0, %v598_v6 }
   0x2   :  { %v493_v4 = vpack.c.bf16 %v29_v1, %v28_v0  ;;  %v31_v5 = vld [vmem:[%s839_s1 + $0x18] sm:$0xff]  ;;  %516 = vmatprep.subr.bf16.mxu1 %v596_v3  ;;  %454 = vmatprep.mubr.msk.f32.mxu1 %vm597_vm0, %v598_v6  ;;  %v32_v8 = vld [vmem:[%s839_s1 + $0x20] sm:$0xff]  ;;  %v33_v9 = vld [vmem:[%s839_s1 + $0x28] sm:$0xff] }
   0x3   :  { %v496_v7 = vpack.c.bf16 %v31_v5, %v30_v2  ;;  %v122_v10 = vld [vmem:[%s841_s3] sm:$0xff]  ;;  %v123_v11 = vld [vmem:[%s841_s3 + $0x8] sm:$0xff]  ;;  %v124_v12 = vld [vmem:[%s841_s3 + $0x10] sm:$0xff]  ;;  %v499_v14 = vpack.c.bf16 %v33_v9, %v32_v8 }
   0x4   :  { %494 = vmatpush3.bf16.msra.mxu0 %v493_v4  ;;  %v125_v13 = vld [vmem:[%s841_s3 + $0x18] sm:$0xff]  ;;  %v517_v15 = vpack.c.bf16 %v123_v11, %v122_v10  ;;  %v34_v16 = vld [vmem:[%s839_s1 + $0x30] sm:$0xff]  ;;  %v126_v19 = vld [vmem:[%s841_s3 + $0x20] sm:$0xff] }
   0x5   :  { %495 = vmatprep.subr.bf16.mxu0 %v596_v3  ;;  %v35_v17 = vld [vmem:[%s839_s1 + $0x38] sm:$0xff]  ;;  %v520_v18 = vpack.c.bf16 %v125_v13, %v124_v12  ;;  %v127_v20 = vld [vmem:[%s841_s3 + $0x28] sm:$0xff] }
   0x6   :  { %518 = vmatpush3.bf16.msra.mxu1 %v517_v15 }
   0x7   :  { %519 = vmatprep.subr.bf16.mxu1 %v596_v3 }
   0x8   :  { %497 = vmatpush3.bf16.msra.mxu0 %v496_v7 }
   0x9   :  { %498 = vmatprep.subr.bf16.mxu0 %v596_v3 }
   0xa   :  { %12 = vsyncpa [#allocation3], 0  ;;  %v502_v21 = vpack.c.bf16 %v35_v17, %v34_v16  ;;  %v36_v22 = vld [vmem:[%s839_s1 + $0x40] sm:$0xff]  ;;  %v37_v23 = vld [vmem:[%s839_s1 + $0x48] sm:$0xff]  ;;  %521 = vmatpush3.bf16.msra.mxu1 %v520_v18  ;;  %v523_v24 = vpack.c.bf16 %v127_v20, %v126_v19 }
   0xb   :  { %522 = vmatprep.subr.bf16.mxu1 %v596_v3  ;;  %v128_v25 = vld [vmem:[%s841_s3 + $0x30] sm:$0xff]  ;;  %v129_v26 = vld [vmem:[%s841_s3 + $0x38] sm:$0xff]  ;;  %v505_v27 = vpack.c.bf16 %v37_v23, %v36_v22  ;;  %v130_v31 = vld [vmem:[%s841_s3 + $0x40] sm:$0xff] }
   0xc   :  { %500 = vmatpush3.bf16.msra.mxu0 %v499_v14  ;;  %v38_v28 = vld [vmem:[%s839_s1 + $0x50] sm:$0xff]  ;;  %v39_v29 = vld [vmem:[%s839_s1 + $0x58] sm:$0xff]  ;;  %v526_v30 = vpack.c.bf16 %v129_v26, %v128_v25  ;;  %v131_v32 = vld [vmem:[%s841_s3 + $0x48] sm:$0xff] }
   0xd   :  { %501 = vmatprep.subr.bf16.mxu0 %v596_v3  ;;  %v508_v33 = vpack.c.bf16 %v39_v29, %v38_v28  ;;  %v40_v34 = vld [vmem:[%s839_s1 + $0x60] sm:$0xff]  ;;  %v41_v35 = vld [vmem:[%s839_s1 + $0x68] sm:$0xff]  ;;  %v529_v36 = vpack.c.bf16 %v131_v32, %v130_v31  ;;  %v132_v37 = vld [vmem:[%s841_s3 + $0x50] sm:$0xff] }
   0xe   :  { %524 = vmatpush3.bf16.msra.mxu1 %v523_v24  ;;  %v133_v38 = vld [vmem:[%s841_s3 + $0x58] sm:$0xff]  ;;  %v511_v39 = vpack.c.bf16 %v41_v35, %v40_v34  ;;  %v42_v40 = vld [vmem:[%s839_s1 + $0x70] sm:$0xff]  ;;  %v134_v43 = vld [vmem:[%s841_s3 + $0x60] sm:$0xff] }
   0xf   :  { %525 = vmatprep.subr.bf16.mxu1 %v596_v3  ;;  %v43_v41 = vld [vmem:[%s839_s1 + $0x78] sm:$0xff]  ;;  %v532_v42 = vpack.c.bf16 %v133_v38, %v132_v37  ;;  %v135_v44 = vld [vmem:[%s841_s3 + $0x68] sm:$0xff]  ;;  %v27_v47 = vld [vmem:[%s838_s0] sm:$0xff] }
  0x10   :  { %503 = vmatpush3.bf16.msra.mxu0 %v502_v21  ;;  %v514_v45 = vpack.c.bf16 %v43_v41, %v42_v40  ;;  %v535_v46 = vpack.c.bf16 %v135_v44, %v134_v43  ;;  %v136_v48 = vld [vmem:[%s841_s3 + $0x70] sm:$0xff]  ;;  %v137_v49 = vld [vmem:[%s841_s3 + $0x78] sm:$0xff]  ;;  %v216_v51 = vld [vmem:[%s843_s5] sm:$0xff] }
  0x11   :  { %504 = vmatprep.subr.bf16.mxu0 %v596_v3  ;;  %v538_v50 = vpack.c.bf16 %v137_v49, %v136_v48  ;;  %v217_v52 = vld [vmem:[%s843_s5 + $0x8] sm:$0xff]  ;;  %v218_v53 = vld [vmem:[%s843_s5 + $0x10] sm:$0xff]  ;;  %v219_v55 = vld [vmem:[%s843_s5 + $0x18] sm:$0xff] }
  0x12   :  { %527 = vmatpush3.bf16.msra.mxu1 %v526_v30  ;;  %v541_v54 = vpack.c.bf16 %v217_v52, %v216_v51  ;;  %v544_v56 = vpack.c.bf16 %v219_v55, %v218_v53  ;;  %v220_v57 = vld [vmem:[%s843_s5 + $0x20] sm:$0xff]  ;;  %v221_v58 = vld [vmem:[%s843_s5 + $0x28] sm:$0xff]  ;;  %v222_v60 = vld [vmem:[%s843_s5 + $0x30] sm:$0xff] }
  0x13   :  { %528 = vmatprep.subr.bf16.mxu1 %v596_v3  ;;  %v547_v59 = vpack.c.bf16 %v221_v58, %v220_v57  ;;  %v223_v61 = vld [vmem:[%s843_s5 + $0x38] sm:$0xff]  ;;  %v224_v63 = vld [vmem:[%s843_s5 + $0x40] sm:$0xff]  ;;  %v225_v0 = vld [vmem:[%s843_s5 + $0x48] sm:$0xff] }
  0x14   :  { %506 = vmatpush3.bf16.msra.mxu0 %v505_v27  ;;  %v550_v62 = vpack.c.bf16 %v223_v61, %v222_v60  ;;  %v553_v1 = vpack.c.bf16 %v225_v0, %v224_v63  ;;  %v226_v2 = vld [vmem:[%s843_s5 + $0x50] sm:$0xff]  ;;  %v227_v4 = vld [vmem:[%s843_s5 + $0x58] sm:$0xff]  ;;  %v229_v7 = vld [vmem:[%s843_s5 + $0x68] sm:$0xff] }
  0x15   :  { %507 = vmatprep.subr.bf16.mxu0 %v596_v3  ;;  %v556_v5 = vpack.c.bf16 %v227_v4, %v226_v2  ;;  %v333_v9 = vld [vmem:[%s840_s2] ss:$0 sm:$0xff]  ;;  %v230_v14 = vld [vmem:[%s843_s5 + $0x70] sm:$0xff]  ;;  %v231_v15 = vld [vmem:[%s843_s5 + $0x78] sm:$0xff] }
  0x16   :  { %530 = vmatpush3.bf16.msra.mxu1 %v529_v36  ;;  %v562_v16 = vpack.c.bf16 %v231_v15, %v230_v14  ;;  %v335_v21 = vld [vmem:[%s844_s6] ss:$0 sm:$0xff] }
  0x17   :  { %531 = vmatprep.subr.bf16.mxu1 %v596_v3 }
  0x18   :  { %509 = vmatpush3.bf16.msra.mxu0 %v508_v33 }
  0x19   :  { %510 = vmatprep.subr.bf16.mxu0 %v596_v3 }
  0x1a   :  { %533 = vmatpush3.bf16.msra.mxu1 %v532_v42 }
  0x1b   :  { %534 = vmatprep.subr.bf16.mxu1 %v596_v3 }
  0x1c   :  { %512 = vmatpush3.bf16.msra.mxu0 %v511_v39 }
  0x1d   :  { %513 = vmatprep.subr.bf16.mxu0 %v596_v3 }
  0x1e   :  { %536 = vmatpush3.bf16.msra.mxu1 %v535_v46 }
  0x1f   :  { %537 = vmatprep.subr.bf16.mxu1 %v596_v3 }
  0x20   :  { %515 = vmatpush3.bf16.msra.mxu0 %v514_v45 }
  0x21   :  { %540 = vmatprep.subr.bf16.mxu0 %v596_v3 }
  0x22   :  { %539 = vmatpush3.bf16.msra.mxu1 %v538_v50 }
  0x23   :  { %420 = vmatmul.mubr.f32.vlgmr.msra.gmra.mrb[0].mxu0 %v27_v47 }
  0x24   :  { %489 = vmatprep.mubr.msk.f32.mxu0 %vm597_vm0, %v598_v6  ;;  %542 = vmatpush3.bf16.msra.mxu0 %v541_v54  ;;  %v228_v6 = vld [vmem:[%s843_s5 + $0x60] sm:$0xff] }
  0x25   :  { %543 = vmatprep.subr.bf16.mxu0 %v596_v3  ;;  %v559_v8 = vpack.c.bf16 %v229_v7, %v228_v6 }
  0x28   :  { %545 = vmatpush3.bf16.msra.mxu0 %v544_v56 }
  0x29   :  { %546 = vmatprep.subr.bf16.mxu0 %v596_v3 }
  0x2c   :  { %548 = vmatpush3.bf16.msra.mxu0 %v547_v59 }
  0x2d   :  { %549 = vmatprep.subr.bf16.mxu0 %v596_v3 }
  0x30   :  { %551 = vmatpush3.bf16.msra.mxu0 %v550_v62 }
  0x31   :  { %552 = vmatprep.subr.bf16.mxu0 %v596_v3 }
  0x34   :  { %554 = vmatpush3.bf16.msra.mxu0 %v553_v1 }
  0x35   :  { %555 = vmatprep.subr.bf16.mxu0 %v596_v3 }
  0x38   :  { %557 = vmatpush3.bf16.msra.mxu0 %v556_v5 }
  0x39   :  { %558 = vmatprep.subr.bf16.mxu0 %v596_v3 }
  0x3c   :  { %560 = vmatpush3.bf16.msra.mxu0 %v559_v8 }
  0x3d   :  { %561 = vmatprep.subr.bf16.mxu0 %v596_v3  ;;  %v334_v3 = vld [vmem:[%s842_s4] ss:$0 sm:$0xff]  ;;  %s599_s4 = smov [#allocation2]  }
  0x3e   :  { %s325_s5 = sshll.u32 %s599_s4, 4  ;;  %s326_s5 = int_to_ptr.vmem [resolvable:$true] %s325_s5 }
  0x3f   :  { %s572_s29 = scalar_lea.vmem %s326_s5, 128  ;;  %p577_p1 = scmp.lt.s32.totalorder %s326_s5, %s326_s5 }
  0x40   :  { %563 = vmatpush3.bf16.msra.mxu0 %v562_v16  ;;  %p573_p0 = scmp.ne.s32.totalorder %s326_s5, %s572_s29  ;;  %p578_p2 = scmp.lt.s32.totalorder %s572_s29, %s572_s29 }
  0x42   :  { %p579_p3 = por %p578_p2, %p577_p1 }
  0x44   :  { %p580_p4 = pnand %p579_p3, %p573_p0 }
  0xf6   :  { %v117_v10 = vpop.f32.mrb[0].mxu0 }
  0xf7   :  { %v118_v11 = vadd.f32 %v333_v9, %v117_v10  ;;  %v421_v12 = vpop.f32.mrb[1].mxu0 }
  0xf9   :  { %v121_v13 = vmax.f32 %v118_v11, 0.0 }
  0xfb   :  { %455 = vmatmul.mubr.f32.vlgmr.msra.gmra.mrb[0].mxu1 %v121_v13 }
 0x1ce   :  { %v211_v17 = vpop.f32.mrb[0].mxu1 }
 0x1cf   :  { %v212_v18 = vadd.f32 %v334_v3, %v211_v17  ;;  %v456_v19 = vpop.f32.mrb[1].mxu1 }
 0x1d1   :  { %v215_v20 = vmax.f32 %v212_v18, 0.0 }
 0x1d3   :  { %490 = vmatmul.mubr.f32.vlgmr.msra.gmra.mrb[2].mxu0 %v215_v20 }
 0x2a6   :  { %v305_v22 = vpop.f32.mrb[2].mxu0 }
 0x2a7   :  { %v306_v23 = vadd.f32 %v335_v21, %v305_v22  ;;  %v491_v24 = vpop.f32.mrb[3].mxu0 }
 0x2a9   :  { %309 = vmax.xlane.f32.xlu0 %v306_v23 }
 0x336   :  { %v310_v25 = vpop.xlane.xlu0 %309 }
 0x337   :  { %v311_v26 = vsub.f32 %v306_v23, %v310_v25 }
 0x339   :  { %v312_v27 = vmul.f32 1.442695, %v311_v26 }
 0x33b   :  { %568 = vpow2.f32 %v312_v27 }
 0x345   :  { %v569_v28 = vpop.eup %568 }
 0x346   :  { %314 = vadd.xlane.f32.xlu0 %v569_v28 }
 0x3d3   :  { %v315_v29 = vpop.xlane.xlu0 %314 }
 0x3d4   :  { %570 = vrcp.f32 %v315_v29 }
 0x3de   :  { %v571_v30 = vpop.eup %570 }
 0x3df   :  { %v317_v31 = vmul.f32 %v571_v30, %v569_v28 }
 0x3e1   :  { %318 = vst [vmem:[#allocation2] sm:$0xff] %v317_v31 }
 0x3e2   :  { %583 = shalt.err (!%p580_p4)
}
 0x3e3   :  { %s584_s8 = scalar_lea.hbm %s845_s7, 128 }
 0x3e4   :  { %p585_p5 = scmp.ne.s32.totalorder %s845_s7, %s584_s8  ;;  %p588_p6 = scmp.lt.u32.totalorder %s584_s8, %s845_s7 }
 0x3e6   :  { %p590_p7 = pnand %p588_p6, %p585_p5 }
 0x3e8   :  { %593 = shalt.err (!%p590_p7)
}
 0x3e9   :  { %328 = dma.vmem_to_hbm [thread:$0]  %s326_s5, 128, %s845_s7, [#allocation3]  }
 0x3ea   :  { %594 = dma.done.wait [#allocation3], 128  }
 0x3eb   :  { %595 = vsyncadd [#allocation3], 4294967168 }
 0x3ec   :  { %332 = vsyncpa [#allocation3], 1 }

</bundles_post_ra>
